<compile_context>
chip_gen: v5e
topology: v5e:2x2
jax: 0.10.0
libtpu: 0.0.40
codegen_flags: <defaults>
</compile_context>

<pallas_src>
import functools
from typing import NamedTuple

import jax
import jax.numpy as jnp
import numpy as np
from jax.experimental import pallas as pl
from jax.experimental.pallas import tpu as pltpu


def _round_up(x, m):
    return (x + m - 1) // m * m


class PreparedAdj(NamedTuple):
    adj: jax.Array     # bf16 [n_pad, n_pad] (padded)
    counts: jax.Array  # int32 [num_row_tiles]      nonzero k-blocks per row tile
    kidx: jax.Array    # int32 [num_row_tiles, max_blocks]  their k indices


class AdjMeta(NamedTuple):     # static (Python ints), passed via functools.partial
    n: int
    n_pad: int
    tm: int
    tk: int
    max_blocks: int
    nnz_blocks: int


def prepare_adjacency(adj, *, max_tm=1024, max_tk=512):
    """One-time (outside jit) adjacency prep: pad + cast to bf16 and build the
    per-row-tile block-occupancy lists used for sparse block skipping."""
    n = int(adj.shape[0])
    assert adj.shape == (n, n)
    n_pad = _round_up(n, 128)
    if n_pad <= max_tk:
        tm = tk = n_pad                       # single block in both dims
    else:
        tk = max_tk
        tm = max_tm if n_pad >= max_tm else tk
        n_pad = _round_up(n, tm)              # tm is a multiple of tk
    num_i, num_k = n_pad // tm, n_pad // tk

    # bf16 cast + zero pad ONCE (dominant HBM stream halved; padding is exact
    # for a linear propagation — padded rows/cols stay zero, sliced off later).
    adj_p = jnp.pad(adj.astype(jnp.bfloat16), ((0, n_pad - n), (0, n_pad - n)))

    # (num_i, num_k) occupancy of (tm, tk) adjacency blocks (host, one-time).
    occ = np.asarray(jax.device_get(
        jnp.any(adj_p.reshape(num_i, tm, num_k, tk) != 0, axis=(1, 3))))
    counts = occ.sum(axis=1).astype(np.int32)
    max_blocks = max(int(counts.max()) if counts.size else 0, 1)
    kidx = np.zeros((num_i, max_blocks), dtype=np.int32)
    for i in range(num_i):
        nz = np.flatnonzero(occ[i])
        kidx[i, :nz.size] = nz

    prep = PreparedAdj(adj=adj_p, counts=jnp.asarray(counts),
                       kidx=jnp.asarray(kidx))
    meta = AdjMeta(n=n, n_pad=n_pad, tm=tm, tk=tk, max_blocks=max_blocks,
                   nnz_blocks=int(counts.sum()))
    return prep, meta


# ----------------------------------------------------------------------------
# Pallas kernel: one propagation hop  out = adj @ cur (block-sparse MXU matmul)
#   adj: bf16 [n_pad, n_pad]   cur: bf16 [n_pad, h_pad]   out: f32 [n_pad, h_pad]
# grid = (row tiles i, nonzero k-block slots); the output block index is
# constant along k, so the out VMEM buffer is the f32 accumulator.
# ----------------------------------------------------------------------------
def _make_kernel(tk, resident):
    if resident:
        def kernel(cnt_ref, kidx_ref, adj_ref, cur_ref, out_ref):
            i, k = pl.program_id(0), pl.program_id(1)

            @pl.when(k == 0)
            def _init():
                out_ref[...] = jnp.zeros_like(out_ref)

            @pl.when(k < cnt_ref[i])        # skip padded / empty block slots
            def _acc():
                start = pl.multiple_of(kidx_ref[i, k] * tk, tk)
                out_ref[...] += jnp.dot(
                    adj_ref[...], cur_ref[pl.ds(start, tk), :],
                    preferred_element_type=jnp.float32)
    else:
        def kernel(cnt_ref, kidx_ref, adj_ref, cur_ref, out_ref):
            i, k = pl.program_id(0), pl.program_id(1)

            @pl.when(k == 0)
            def _init():
                out_ref[...] = jnp.zeros_like(out_ref)

            @pl.when(k < cnt_ref[i])
            def _acc():
                out_ref[...] += jnp.dot(
                    adj_ref[...], cur_ref[...],
                    preferred_element_type=jnp.float32)
    return kernel


def _adj_block_spec(tm, tk, max_blocks):
    index_map = lambda i, k, cnt, kidx: (i, kidx[i, k])
    if max_blocks >= 3:
        # Third adjacency buffer hides the row-tile-boundary DMA collision.
        try:
            return pl.BlockSpec((tm, tk), index_map,
                                pipeline_mode=pl.Buffered(3))
        except Exception:
            pass
    return pl.BlockSpec((tm, tk), index_map)


@functools.lru_cache(maxsize=None)
def _build_spmm(n_pad, h_pad, tm, tk, max_blocks, nnz_blocks, resident):
    num_i = n_pad // tm
    grid = (num_i, max_blocks)

    adj_spec = _adj_block_spec(tm, tk, max_blocks)
    if resident:
        # Whole bf16 embedding slab stays in VMEM; kernel slices it with pl.ds.
        cur_spec = pl.BlockSpec((n_pad, h_pad), lambda i, k, cnt, kidx: (0, 0))
        cur_vmem = 2 * n_pad * h_pad * 2
        cur_stream = n_pad * h_pad * 2
    else:
        cur_spec = pl.BlockSpec((tk, h_pad),
                                lambda i, k, cnt, kidx: (kidx[i, k], 0))
        cur_vmem = 2 * tk * h_pad * 2
        cur_stream = nnz_blocks * tk * h_pad * 2
    out_spec = pl.BlockSpec((tm, h_pad), lambda i, k, cnt, kidx: (i, 0))

    # 3 adj bufs + cur bufs + double-buffered f32 output accumulator.
    vmem_budget = 3 * tm * tk * 2 + cur_vmem + 2 * tm * h_pad * 4
    # 48 MiB cap keeps ~25%+ headroom even on v7x (64 MiB physical VMEM);
    # well under v5e/v6e's 128 MiB.
    vmem_limit = int(min(max(2 * vmem_budget, 16 << 20), 48 << 20))

    return pl.pallas_call(
        _make_kernel(tk, resident),
        out_shape=jax.ShapeDtypeStruct((n_pad, h_pad), jnp.float32),
        grid_spec=pltpu.PrefetchScalarGridSpec(
            num_scalar_prefetch=2,          # counts, kidx -> SMEM
            grid=grid,
            in_specs=[adj_spec, cur_spec],
            out_specs=out_spec,
        ),
        compiler_params=pltpu.CompilerParams(
            # Row tiles are independent -> megacore split; the k reduction
            # (output-resident accumulator) stays arbitrary.
            dimension_semantics=("parallel", "arbitrary"),
            vmem_limit_bytes=vmem_limit,
        ),
        cost_estimate=pl.CostEstimate(
            flops=2 * nnz_blocks * tm * tk * h_pad,
            transcendentals=0,
            bytes_accessed=(nnz_blocks * tm * tk * 2     # nonzero adj blocks (bf16)
                            + cur_stream                 # bf16 cur
                            + n_pad * h_pad * 4),        # f32 out
        ),
    )


def gcn_propagate(prep: PreparedAdj, meta: AdjMeta, emb, hop):
    """mean_{h=0..hop} adj^h @ emb using the block-sparse Pallas matmul."""
    n, h = emb.shape
    assert n == meta.n
    h_pad = _round_up(h, 128)               # lane-dense hidden (no vst.msk)

    cur = jnp.pad(emb.astype(jnp.float32),
                  ((0, meta.n_pad - n), (0, h_pad - h)))

    # Keep the whole bf16 embedding slab VMEM-resident when it fits comfortably
    # on every generation (v7x = 64 MiB physical); otherwise stream bf16 slices.
    resident = meta.n_pad * h_pad * 2 <= (12 << 20)
    spmm = _build_spmm(meta.n_pad, h_pad, meta.tm, meta.tk, meta.max_blocks,
                       meta.nnz_blocks, resident)

    acc = cur                               # f32 running sum (hop-0 term)
    cur_bf16 = cur.astype(jnp.bfloat16)     # only the matmul operands are bf16
    for _ in range(hop):                    # hop is a small static int
        nxt = spmm(prep.counts, prep.kidx, prep.adj, cur_bf16)   # f32
        acc = acc + nxt                     # tiny (n, h) f32 add in XLA
        cur_bf16 = nxt.astype(jnp.bfloat16)
    out = acc * (1.0 / float(hop + 1))
    return out[:n, :h].astype(emb.dtype)


# ----------------------------------------------------------------------------
# DESIGN model (forward pass only)
# ----------------------------------------------------------------------------
def xavier_uniform(key, shape, dtype=jnp.float32):
    fan_in, fan_out = shape
    bound = (6.0 / (fan_in + fan_out)) ** 0.5
    return jax.random.uniform(key, shape, dtype, minval=-bound, maxval=bound)


def init_design_params(key, n_users, n_items, hidden):
    k1, k2, k3, k4 = jax.random.split(key, 4)
    return {
        "user1_embs": xavier_uniform(k1, (n_users, hidden)),
        "item1_embs": xavier_uniform(k2, (n_items, hidden)),
        "user2_embs": xavier_uniform(k3, (n_users, hidden)),
        "item2_embs": xavier_uniform(k4, (n_items, hidden)),
    }


def design_forward(params, users, pos, neg, user_embs, item_embs,
                   S_prep, A_prep, *, n_users, hop, S_meta, A_meta):
    h = user_embs.shape[1]

    # Both S-propagations (user_embs and user1_embs) share the same adjacency:
    # fuse along the hidden axis so S is streamed exactly `hop` times.
    s_in = jnp.concatenate([user_embs, params["user1_embs"]], axis=1)
    s_out = gcn_propagate(S_prep, S_meta, s_in, hop)
    all_user_embs_S = s_out[:, :h]
    all_user_embs_social = s_out[:, h:]

    # Same fusion for the two A-propagations.
    a_main = jnp.concatenate([user_embs, item_embs], axis=0)
    a_rating = jnp.concatenate([params["user2_embs"], params["item2_embs"]],
                               axis=0)
    a_in = jnp.concatenate([a_main, a_rating], axis=1)
    a_out = gcn_propagate(A_prep, A_meta, a_in, hop)
    all_user_embs_A = a_out[:n_users, :h]
    all_item_embs = a_out[n_users:, :h]
    all_user_embs_rating = a_out[:n_users, h:]
    all_item_embs_rating = a_out[n_users:, h:]

    all_user_embs = 0.5 * all_user_embs_S + 0.5 * all_user_embs_A
    all_item_embs_social = params["item1_embs"]

    return (all_user_embs[users], all_item_embs[pos], all_item_embs[neg],
            all_user_embs_social[users], all_item_embs_social[pos],
            all_item_embs_social[neg],
            all_user_embs_rating[users], all_item_embs_rating[pos],
            all_item_embs_rating[neg])


# Pure-JAX reference of the propagation (matches the kernel's bf16 operand
# quantization; f32 accumulation and f32 hop-0 term as in the kernel path).
def _gcn_ref(adj, emb, hop):
    a = adj.astype(jnp.bfloat16).astype(jnp.float32)
    cur = emb.astype(jnp.float32)
    acc = cur
    for _ in range(hop):
        cur = jnp.dot(a, cur.astype(jnp.bfloat16).astype(jnp.float32),
                      precision=jax.lax.Precision.HIGHEST)
        acc = acc + cur
    return acc / float(hop + 1)


if __name__ == "__main__":
    n_users, n_items, hidden, hop = 8, 8, 32, 2
    batch = 4
    key = jax.random.PRNGKey(0)
    kp, ku, ki, kS, kA, kidx, kS2, ke2 = jax.random.split(key, 8)

    params = init_design_params(kp, n_users, n_items, hidden)
    user_embs = xavier_uniform(ku, (n_users, hidden))
    item_embs = xavier_uniform(ki, (n_items, hidden))

    # Dense row-normalized adjacencies standing in for the sparse ones.
    S = jax.random.uniform(kS, (n_users, n_users), jnp.float32)
    S = S / jnp.sum(S, axis=1, keepdims=True)
    n_all = n_users + n_items
    A = jax.random.uniform(kA, (n_all, n_all), jnp.float32)
    A = A / jnp.sum(A, axis=1, keepdims=True)

    # One-time adjacency prep (bf16 cast + pad + block-occupancy lists),
    # hoisted out of the per-forward path.
    S_prep, S_meta = prepare_adjacency(S)
    A_prep, A_meta = prepare_adjacency(A)

    ku_idx, kp_idx, kn_idx = jax.random.split(kidx, 3)
    users = jax.random.randint(ku_idx, (batch,), 0, n_users)
    pos = jax.random.randint(kp_idx, (batch,), 0, n_items)
    neg = jax.random.randint(kn_idx, (batch,), 0, n_items)

    fwd = jax.jit(functools.partial(design_forward, n_users=n_users, hop=hop,
                                    S_meta=S_meta, A_meta=A_meta))
    outs = fwd(params, users, pos, neg, user_embs, item_embs, S_prep, A_prep)
    outs = jax.block_until_ready(outs)

    # 1) Pallas propagation vs pure-JAX reference (dense adjacency).
    got = gcn_propagate(S_prep, S_meta, user_embs, hop)
    ref = _gcn_ref(S, user_embs, hop)
    assert jnp.allclose(got, ref, atol=2e-2, rtol=2e-2), "GCN kernel mismatch"

    # 2) Fused forward output vs unfused reference path.
    ref_S = _gcn_ref(S, user_embs, hop)
    ref_A = _gcn_ref(A, jnp.concatenate([user_embs, item_embs], axis=0), hop)
    ref_users = 0.5 * ref_S + 0.5 * ref_A[:n_users]
    assert jnp.allclose(outs[0], ref_users[users], atol=2e-2, rtol=2e-2), \
        "fused forward mismatch"

    # 3) Block-sparse skip path on a multi-tile adjacency (128x128 tiles,
    #    ~half the blocks empty -> counts/kidx actually skip work).
    n2 = 300
    S2 = jax.random.uniform(kS2, (n2, n2), jnp.float32)
    bm = ((jnp.arange(3)[:, None] + jnp.arange(3)[None, :]) % 2 == 0)
    blk_mask = jnp.kron(bm.astype(jnp.float32),
                        jnp.ones((128, 128), jnp.float32))[:n2, :n2]
    S2 = S2 * blk_mask
    S2 = S2 / jnp.sum(S2, axis=1, keepdims=True)
    emb2 = xavier_uniform(ke2, (n2, hidden))
    S2_prep, S2_meta = prepare_adjacency(S2, max_tm=128, max_tk=128)
    got2 = gcn_propagate(S2_prep, S2_meta, emb2, hop)
    ref2 = _gcn_ref(S2, emb2, hop)
    assert jnp.allclose(got2, ref2, atol=2e-2, rtol=2e-2), \
        "block-sparse GCN kernel mismatch"

    assert outs[0].shape == (batch, hidden)
    assert outs[4].shape == (batch, hidden)
    assert outs[8].shape == (batch, hidden)

    print("KERNEL_OK")
</pallas_src>

<mosaic_0001>
module attributes {stable_mosaic.version = 11 : i64} {
  func.func @kernel(%arg0: i32, %arg1: i32, %arg2: memref<1xi32, #tpu.memory_space<smem>>, %arg3: memref<1x1xi32, #tpu.memory_space<smem>>, %arg4: memref<128x128xbf16, #tpu.memory_space<vmem>>, %arg5: memref<128x128xbf16, #tpu.memory_space<vmem>>, %arg6: memref<128x128xf32, #tpu.memory_space<vmem>>) attributes {dimension_semantics = [#tpu.dimension_semantics<parallel>, #tpu.dimension_semantics<arbitrary>], iteration_bounds = array<i64: 1, 1>, scalar_prefetch = 2 : i64, scratch_operands = 0 : i64, tpu.core_type = #tpu.core_type<tc>, window_params = [{transform_indices = @transform_0, window_bounds = array<i64: 128, 128>}, {pipeline_mode = #tpu.pipeline_mode<synchronous>, transform_indices = @transform_1, window_bounds = array<i64: 128, 128>}, {transform_indices = @transform_2, window_bounds = array<i64: 128, 128>}]} {
    %c0_i32 = arith.constant 0 : i32
    %0 = arith.cmpi eq, %arg1, %c0_i32 : i32
    %1 = arith.extui %0 : i1 to i32
    %c0_i32_0 = arith.constant 0 : i32
    %2 = arith.cmpi ne, %1, %c0_i32_0 : i32
    scf.if %2 {
      %cst = arith.constant 0.000000e+00 : f32
      %8 = vector.broadcast %cst : f32 to vector<128x128xf32>
      %c0 = arith.constant 0 : index
      %c0_2 = arith.constant 0 : index
      %9 = vector.load %arg6[%c0, %c0_2] : memref<128x128xf32, #tpu.memory_space<vmem>>, vector<128x128xf32>
      tpu.vector_store %arg6[%c0, %c0_2], %8 {strides = array<i32>} : memref<128x128xf32, #tpu.memory_space<vmem>>, vector<128x128xf32>,
    } else {
    }
    %3 = arith.index_cast %arg0 : i32 to index
    %4 = memref.load %arg2[%3] : memref<1xi32, #tpu.memory_space<smem>>
    %5 = arith.cmpi slt, %arg1, %4 : i32
    %6 = arith.extui %5 : i1 to i32
    %c0_i32_1 = arith.constant 0 : i32
    %7 = arith.cmpi ne, %6, %c0_i32_1 : i32
    scf.if %7 {
      %8 = arith.index_cast %arg0 : i32 to index
      %9 = arith.index_cast %arg1 : i32 to index
      %10 = memref.load %arg3[%8, %9] : memref<1x1xi32, #tpu.memory_space<smem>>
      %c128_i32 = arith.constant 128 : i32
      %11 = arith.muli %10, %c128_i32 : i32
      %12 = tpu.assume_multiple %11, 128 : i32
      %c0 = arith.constant 0 : index
      %c0_2 = arith.constant 0 : index
      %13 = vector.load %arg6[%c0, %c0_2] : memref<128x128xf32, #tpu.memory_space<vmem>>, vector<128x128xf32>
      %c0_3 = arith.constant 0 : index
      %c0_4 = arith.constant 0 : index
      %14 = vector.load %arg4[%c0_3, %c0_4] : memref<128x128xbf16, #tpu.memory_space<vmem>>, vector<128x128xbf16>
      %15 = arith.index_cast %12 : i32 to index
      %c0_5 = arith.constant 0 : index
      %16 = vector.load %arg5[%15, %c0_5] : memref<128x128xbf16, #tpu.memory_space<vmem>>, vector<128x128xbf16>
      %cst = arith.constant dense<0.000000e+00> : vector<128x128xf32>
      %17 = tpu.matmul %14, %16, %cst {dimension_numbers = #tpu.dot_dimension_numbers<[1], [0], [0], [1], [0, 0, 1, 1], [], []>} : vector<128x128xbf16>, vector<128x128xbf16>, vector<128x128xf32> -> vector<128x128xf32>
      %18 = arith.addf %13, %17 : vector<128x128xf32>
      %c0_6 = arith.constant 0 : index
      %c0_7 = arith.constant 0 : index
      %19 = vector.load %arg6[%c0_6, %c0_7] : memref<128x128xf32, #tpu.memory_space<vmem>>, vector<128x128xf32>
      tpu.vector_store %arg6[%c0_6, %c0_7], %18 {strides = array<i32>} : memref<128x128xf32, #tpu.memory_space<vmem>>, vector<128x128xf32>,
    } else {
    }
    return
  }
  func.func @transform_0(%arg0: i32, %arg1: i32, %arg2: memref<1xi32, #tpu.memory_space<smem>>, %arg3: memref<1x1xi32, #tpu.memory_space<smem>>) -> (i32, i32) {
    %0 = arith.index_cast %arg0 : i32 to index
    %1 = arith.index_cast %arg1 : i32 to index
    %2 = memref.load %arg3[%0, %1] : memref<1x1xi32, #tpu.memory_space<smem>>
    %c0_i32 = arith.constant 0 : i32
    return %arg0, %2 : i32, i32
  }
  func.func @transform_1(%arg0: i32, %arg1: i32, %arg2: memref<1xi32, #tpu.memory_space<smem>>, %arg3: memref<1x1xi32, #tpu.memory_space<smem>>) -> (i32, i32) {
    %c0_i32 = arith.constant 0 : i32
    %c0_i32_0 = arith.constant 0 : i32
    %c0_i32_1 = arith.constant 0 : i32
    return %c0_i32, %c0_i32_0 : i32, i32
  }
  func.func @transform_2(%arg0: i32, %arg1: i32, %arg2: memref<1xi32, #tpu.memory_space<smem>>, %arg3: memref<1x1xi32, #tpu.memory_space<smem>>) -> (i32, i32) {
    %c0_i32 = arith.constant 0 : i32
    %c0_i32_0 = arith.constant 0 : i32
    return %arg0, %c0_i32 : i32, i32
  }
}

</mosaic_0001>

<bundles_post_ra>
// kernel: design_forward.6
= control target key start
LH: loop header
LB: loop body
LE: loop exit
PB: predicated region body
PF: predicated region fallthrough
CT: control target
= control target key end

     0   :  { %v428_v0 = vmov 0.0   ;;  %s636_s0 = inlined_call_operand.<no memory space> [shape: s32[1], index: 0, kind: input, shape index: {}]   ;;  %s637_s1 = inlined_call_operand.<no memory space> [shape: s32[1,1], index: 1, kind: input, shape index: {}]   ;;  %s638_s3 = inlined_call_operand.vmem [shape: bf16[128,128], index: 3, kind: input, shape index: {}]   ;;  %s639_s4 = inlined_call_operand.vmem [shape: f32[128,128], index: 4, kind: output, shape index: {}]   ;;  %s640_s2 = inlined_call_operand.vmem [shape: bf16[128,128], index: 2, kind: input, shape index: {}]  }
   0x1   :  { %10 = sst [smem:[#allocation4]] %s637_s1  ;;  %p39_p0 = scmp.lt.s32.totalorder %s637_s1, 0  ;;  %51 = vst [vmem:[%s639_s4] sm:$0xff] %v428_v0 }
   0x2   :  { %52 = vst [vmem:[%s639_s4 + $0x8] sm:$0xff] %v428_v0  ;;  %p320_p1 = scmp.le.s32.totalorder %s636_s0, 0 }
   0x3   :  { %s642_s1 = smov (!%p39_p0, %s637_s1), 0  ;;  %53 = vst [vmem:[%s639_s4 + $0x10] sm:$0xff] %v428_v0  ;;  %s75_s5 = sld [smem:[#allocation4]] (!%p320_p1) }
   0x4   :  { %54 = vst [vmem:[%s639_s4 + $0x18] sm:$0xff] %v428_v0  ;;  %s318_s29 = sshll.u32 %s642_s1, 2 }
   0x5   :  { %55 = vst [vmem:[%s639_s4 + $0x20] sm:$0xff] %v428_v0  ;;  %s481_s8 = scalar_lea.vmem %s640_s2, %s318_s29 }
   0x6   :  { %56 = vst [vmem:[%s639_s4 + $0x28] sm:$0xff] %v428_v0 }
   0x7   :  { %57 = vst [vmem:[%s639_s4 + $0x30] sm:$0xff] %v428_v0 }
   0x8   :  { %58 = vst [vmem:[%s639_s4 + $0x38] sm:$0xff] %v428_v0 }
   0x9   :  { %59 = vst [vmem:[%s639_s4 + $0x40] sm:$0xff] %v428_v0  ;;  %s321_s6 = sshll.u32 (!%p320_p1), %s75_s5, 7 }
   0xa   :  { %60 = vst [vmem:[%s639_s4 + $0x48] sm:$0xff] %v428_v0  ;;  %s109_s7 = sshra.s32 (!%p320_p1), %s321_s6, 3 }
   0xb   :  { %61 = vst [vmem:[%s639_s4 + $0x50] sm:$0xff] %v428_v0  ;;  %s322_s9 = sshll.u32 (!%p320_p1), %s109_s7, 2 }
   0xc   :  { %62 = vst [vmem:[%s639_s4 + $0x58] sm:$0xff] %v428_v0  ;;  %71 = sbr.rel (%p320_p1) target bundleno = 210 (0xd2), region = 17  ;;  %s522_s12 = scalar_lea.vmem (!%p320_p1), %s638_s3, %s322_s9 }
   0xd   :  { %63 = vst [vmem:[%s639_s4 + $0x60] sm:$0xff] %v428_v0 }
   0xe   :  { %64 = vst [vmem:[%s639_s4 + $0x68] sm:$0xff] %v428_v0 }
   0xf   :  { %65 = vst [vmem:[%s639_s4 + $0x70] sm:$0xff] %v428_v0 }
  0x10   :  { %66 = vst [vmem:[%s639_s4 + $0x78] sm:$0xff] %v428_v0 }
  0x11   :  { %v402_v1 = vld [vmem:[%s522_s12 + $0x38] sm:$0xff]  ;;  %v401_v2 = vld [vmem:[%s522_s12 + $0x30] sm:$0xff]  ;;  %v400_v3 = vld [vmem:[%s522_s12 + $0x28] sm:$0xff] }
  0x12   :  { %225 = vmatpush.bf16.msra.mxu0 %v402_v1  ;;  %403 = vmatpush.bf16.msra.mxu1 %v402_v1  ;;  %v399_v4 = vld [vmem:[%s522_s12 + $0x20] sm:$0xff]  ;;  %v398_v5 = vld [vmem:[%s522_s12 + $0x18] sm:$0xff]  ;;  %v397_v6 = vld [vmem:[%s522_s12 + $0x10] sm:$0xff] }
  0x13   :  { %404 = vmatpush.bf16.msra.mxu2 %v402_v1  ;;  %405 = vmatpush.bf16.msra.mxu3 %v402_v1  ;;  %v396_v7 = vld [vmem:[%s522_s12 + $0x8] sm:$0xff]  ;;  %v395_v8 = vld [vmem:[%s522_s12] sm:$0xff]  ;;  %v389_v10 = vld [vmem:[%s481_s8 + $0x10] sm:$0xff] }
  0x14   :  { %v387_v9 = vld [vmem:[%s481_s8] sm:$0xff]  ;;  %v393_v12 = vld [vmem:[%s481_s8 + $0x30] sm:$0xff]  ;;  %v388_v13 = vld [vmem:[%s481_s8 + $0x8] sm:$0xff] }
  0x15   :  { %v391_v11 = vld [vmem:[%s481_s8 + $0x20] sm:$0xff]  ;;  %v390_v14 = vld [vmem:[%s481_s8 + $0x18] sm:$0xff]  ;;  %v392_v15 = vld [vmem:[%s481_s8 + $0x28] sm:$0xff] }
  0x16   :  { %226 = vmatpush.bf16.msra.mxu0 %v401_v2  ;;  %406 = vmatpush.bf16.msra.mxu1 %v401_v2  ;;  %v394_v16 = vld [vmem:[%s481_s8 + $0x38] sm:$0xff]  ;;  %v77_v17 = vld [vmem:[%s639_s4] sm:$0xff]  ;;  %v78_v25 = vld [vmem:[%s639_s4 + $0x8] sm:$0xff] }
  0x17   :  { %407 = vmatpush.bf16.msra.mxu2 %v401_v2  ;;  %408 = vmatpush.bf16.msra.mxu3 %v401_v2  ;;  %v81_v18 = vld [vmem:[%s639_s4 + $0x20] sm:$0xff]  ;;  %v82_v26 = vld [vmem:[%s639_s4 + $0x28] sm:$0xff]  ;;  %v79_v37 = vld [vmem:[%s639_s4 + $0x10] sm:$0xff] }
  0x18   :  { %v85_v23 = vld [vmem:[%s639_s4 + $0x40] sm:$0xff]  ;;  %v86_v35 = vld [vmem:[%s639_s4 + $0x48] sm:$0xff]  ;;  %v83_v38 = vld [vmem:[%s639_s4 + $0x30] sm:$0xff] }
  0x19   :  { %v89_v24 = vld [vmem:[%s639_s4 + $0x60] sm:$0xff]  ;;  %v90_v36 = vld [vmem:[%s639_s4 + $0x68] sm:$0xff]  ;;  %v87_v47 = vld [vmem:[%s639_s4 + $0x50] sm:$0xff] }
  0x1a   :  { %227 = vmatpush.bf16.msra.mxu0 %v400_v3  ;;  %409 = vmatpush.bf16.msra.mxu1 %v400_v3  ;;  %v91_v48 = vld [vmem:[%s639_s4 + $0x70] sm:$0xff]  ;;  %v80_v49 = vld [vmem:[%s639_s4 + $0x18] sm:$0xff] }
  0x1b   :  { %410 = vmatpush.bf16.msra.mxu2 %v400_v3  ;;  %411 = vmatpush.bf16.msra.mxu3 %v400_v3  ;;  %v84_v50 = vld [vmem:[%s639_s4 + $0x38] sm:$0xff] }
  0x1c   :  { %v88_v59 = vld [vmem:[%s639_s4 + $0x58] sm:$0xff] }
  0x1d   :  { %v92_v60 = vld [vmem:[%s639_s4 + $0x78] sm:$0xff] }
  0x1e   :  { %228 = vmatpush.bf16.msra.mxu0 %v399_v4  ;;  %412 = vmatpush.bf16.msra.mxu1 %v399_v4 }
  0x1f   :  { %413 = vmatpush.bf16.msra.mxu2 %v399_v4  ;;  %414 = vmatpush.bf16.msra.mxu3 %v399_v4 }
  0x22   :  { %229 = vmatpush.bf16.msra.mxu0 %v398_v5  ;;  %415 = vmatpush.bf16.msra.mxu1 %v398_v5 }
  0x23   :  { %416 = vmatpush.bf16.msra.mxu2 %v398_v5  ;;  %417 = vmatpush.bf16.msra.mxu3 %v398_v5 }
  0x26   :  { %230 = vmatpush.bf16.msra.mxu0 %v397_v6  ;;  %418 = vmatpush.bf16.msra.mxu1 %v397_v6 }
  0x27   :  { %419 = vmatpush.bf16.msra.mxu2 %v397_v6  ;;  %420 = vmatpush.bf16.msra.mxu3 %v397_v6 }
  0x2a   :  { %231 = vmatpush.bf16.msra.mxu0 %v396_v7  ;;  %421 = vmatpush.bf16.msra.mxu1 %v396_v7 }
  0x2b   :  { %422 = vmatpush.bf16.msra.mxu2 %v396_v7  ;;  %423 = vmatpush.bf16.msra.mxu3 %v396_v7 }
  0x2e   :  { %232 = vmatpush.bf16.msra.mxu0 %v395_v8  ;;  %424 = vmatpush.bf16.msra.mxu1 %v395_v8 }
  0x2f   :  { %425 = vmatpush.bf16.msra.mxu2 %v395_v8  ;;  %426 = vmatpush.bf16.msra.mxu3 %v395_v8 }
  0x31   :  { %233 = vmatmul.bf16.vlgmr.msra.gmra.mxu0 %v387_v9  ;;  %243 = vmatmul.bf16.vlgmr.msra.gmra.mxu1 %v389_v10 }
  0x32   :  { %253 = vmatmul.bf16.vlgmr.msra.gmra.mxu2 %v391_v11  ;;  %263 = vmatmul.bf16.vlgmr.msra.gmra.mxu3 %v393_v12 }
  0x41   :  { %238 = vmatmul.bf16.gmra.mxu0 %v388_v13  ;;  %248 = vmatmul.bf16.gmra.mxu1 %v390_v14 }
  0x42   :  { %258 = vmatmul.bf16.gmra.mxu2 %v392_v15  ;;  %268 = vmatmul.bf16.gmra.mxu3 %v394_v16 }
  0xae   :  { %v234_v19 = vpop.f32.mrf.mxu0  ;;  %v244_v20 = vpop.f32.mrf.mxu1 }
  0xaf   :  { %v274_v21 = vadd.f32 %v234_v19, %v77_v17  ;;  %v278_v22 = vadd.f32 %v244_v20, %v81_v18 }
  0xb1   :  { %290 = vst [vmem:[%s639_s4] sm:$0xff] %v274_v21 }
  0xb2   :  { %294 = vst [vmem:[%s639_s4 + $0x20] sm:$0xff] %v278_v22 }
  0xb5   :  { %v254_v27 = vpop.f32.mrf.mxu2  ;;  %v264_v28 = vpop.f32.mrf.mxu3 }
  0xb6   :  { %v282_v29 = vadd.f32 %v254_v27, %v85_v23  ;;  %v286_v30 = vadd.f32 %v264_v28, %v89_v24  ;;  %v236_v31 = vpop.f32.mrf.mxu0  ;;  %v246_v32 = vpop.f32.mrf.mxu1 }
  0xb7   :  { %v275_v33 = vadd.f32 %v236_v31, %v78_v25  ;;  %v279_v34 = vadd.f32 %v246_v32, %v82_v26 }
  0xb8   :  { %298 = vst [vmem:[%s639_s4 + $0x40] sm:$0xff] %v282_v29 }
  0xb9   :  { %302 = vst [vmem:[%s639_s4 + $0x60] sm:$0xff] %v286_v30 }
  0xba   :  { %291 = vst [vmem:[%s639_s4 + $0x8] sm:$0xff] %v275_v33 }
  0xbb   :  { %295 = vst [vmem:[%s639_s4 + $0x28] sm:$0xff] %v279_v34 }
  0xbd   :  { %v256_v39 = vpop.f32.mrf.mxu2  ;;  %v266_v40 = vpop.f32.mrf.mxu3 }
  0xbe   :  { %v283_v41 = vadd.f32 %v256_v39, %v86_v35  ;;  %v287_v42 = vadd.f32 %v266_v40, %v90_v36  ;;  %v239_v43 = vpop.f32.mrf.mxu0  ;;  %v249_v44 = vpop.f32.mrf.mxu1 }
  0xbf   :  { %v276_v45 = vadd.f32 %v239_v43, %v79_v37  ;;  %v280_v46 = vadd.f32 %v249_v44, %v83_v38 }
  0xc0   :  { %299 = vst [vmem:[%s639_s4 + $0x48] sm:$0xff] %v283_v41 }
  0xc1   :  { %303 = vst [vmem:[%s639_s4 + $0x68] sm:$0xff] %v287_v42 }
  0xc2   :  { %292 = vst [vmem:[%s639_s4 + $0x10] sm:$0xff] %v276_v45 }
  0xc3   :  { %296 = vst [vmem:[%s639_s4 + $0x30] sm:$0xff] %v280_v46 }
  0xc5   :  { %v259_v51 = vpop.f32.mrf.mxu2  ;;  %v269_v52 = vpop.f32.mrf.mxu3 }
  0xc6   :  { %v284_v53 = vadd.f32 %v259_v51, %v87_v47  ;;  %v288_v54 = vadd.f32 %v269_v52, %v91_v48  ;;  %v241_v55 = vpop.f32.mrf.mxu0  ;;  %v251_v56 = vpop.f32.mrf.mxu1 }
  0xc7   :  { %v277_v57 = vadd.f32 %v241_v55, %v80_v49  ;;  %v281_v58 = vadd.f32 %v251_v56, %v84_v50 }
  0xc8   :  { %300 = vst [vmem:[%s639_s4 + $0x50] sm:$0xff] %v284_v53 }
  0xc9   :  { %304 = vst [vmem:[%s639_s4 + $0x70] sm:$0xff] %v288_v54 }
  0xca   :  { %293 = vst [vmem:[%s639_s4 + $0x18] sm:$0xff] %v277_v57 }
  0xcb   :  { %297 = vst [vmem:[%s639_s4 + $0x38] sm:$0xff] %v281_v58 }
  0xcd   :  { %v261_v61 = vpop.f32.mrf.mxu2  ;;  %v271_v62 = vpop.f32.mrf.mxu3 }
  0xce   :  { %v285_v63 = vadd.f32 %v261_v61, %v88_v59  ;;  %v289_v0 = vadd.f32 %v271_v62, %v92_v60 }
  0xd0   :  { %301 = vst [vmem:[%s639_s4 + $0x58] sm:$0xff] %v285_v63 }
  0xd1   :  { %305 = vst [vmem:[%s639_s4 + $0x78] sm:$0xff] %v289_v0 }
  0xd2 PF:  {}

</bundles_post_ra>
